<compile_context>
chip_gen: v6e
topology: v6e:2x2x1
jax: 0.10.0
libtpu: 0.0.40
codegen_flags: <defaults>
</compile_context>

<pallas_src>
import jax
import jax.numpy as jnp
from jax import lax
from jax.experimental import pallas as pl
from jax.experimental.pallas import tpu as pltpu


# --------------------------------------------------------------------------
# Pallas kernel: one time-chunk of the fused forward+backward LSTM recurrence
# --------------------------------------------------------------------------
def _bilstm_chunk_kernel(pre_ref, w_ref, out_ref, h_ref, c_ref):
    """pre_ref : (Tc, Bp, 8H)  precomputed x@W_ih^T + (b_ih + b_hh) for this chunk.
                 Columns are gate-major / direction-minor:
                 [i_f i_b | f_f f_b | g_f g_b | o_f o_b], each slot H wide.
                 Forward rows are in natural time; backward rows are already
                 time-reversed (wrapper does the flip).
       w_ref   : (2H, 8H)  block-diagonal merged recurrent weights, same column
                 layout; rows are [h_fwd | h_bwd].
       out_ref : (Tc, Bp, 2H)  hidden states [h_fwd | h_bwd]; forward half at
                 natural time, backward half at reversed time.
       h_ref, c_ref : (Bp, 2H) persistent VMEM carries across time chunks.
    PyTorch gate order: i, f, g, o."""
    Tc = pre_ref.shape[0]
    H2 = out_ref.shape[-1]          # 2 * hidden_size

    @pl.when(pl.program_id(0) == 0)
    def _init():
        h_ref[...] = jnp.zeros_like(h_ref)
        c_ref[...] = jnp.zeros_like(c_ref)

    w = w_ref[...]                  # recurrent weights stay resident
    h = h_ref[...]
    c = c_ref[...]

    # Fully unrolled chunk loop (Tc is a small static block size, <= 32):
    # straight-line code gives the scheduler cross-iteration visibility to
    # overlap the MXU push/pop and EUP latency of the two direction chains.
    for t in range(Tc):
        gates = pre_ref[t] + jnp.dot(h, w, preferred_element_type=jnp.float32)
        i = jax.nn.sigmoid(gates[:, 0 * H2:1 * H2])
        f = jax.nn.sigmoid(gates[:, 1 * H2:2 * H2])
        g = jnp.tanh(gates[:, 2 * H2:3 * H2])
        o = jax.nn.sigmoid(gates[:, 3 * H2:4 * H2])
        c = f * c + i * g
        h = o * jnp.tanh(c)
        out_ref[t] = h              # single (Bp, 2H) store per step

    h_ref[...] = h
    c_ref[...] = c


def _bilstm_layer(pre, w_merged, time_chunk):
    """pre: (Tp, Bp, 8H) -> (Tp, Bp, 2H) via the chunked fused recurrence."""
    Tp, Bp, G8 = pre.shape
    H2 = w_merged.shape[0]
    n_chunks = Tp // time_chunk
    return pl.pallas_call(
        _bilstm_chunk_kernel,
        out_shape=jax.ShapeDtypeStruct((Tp, Bp, H2), jnp.float32),
        grid_spec=pltpu.PrefetchScalarGridSpec(
            num_scalar_prefetch=0,
            grid=(n_chunks,),
            in_specs=[
                pl.BlockSpec((time_chunk, Bp, G8), lambda i: (i, 0, 0)),
                pl.BlockSpec((H2, G8), lambda i: (0, 0)),   # resident across chunks
            ],
            out_specs=pl.BlockSpec((time_chunk, Bp, H2), lambda i: (i, 0, 0)),
            scratch_shapes=[
                pltpu.VMEM((Bp, H2), jnp.float32),          # h carry [fwd | bwd]
                pltpu.VMEM((Bp, H2), jnp.float32),          # c carry [fwd | bwd]
            ],
        ),
        compiler_params=pltpu.CompilerParams(
            dimension_semantics=("arbitrary",),             # serial carry over chunks
        ),
    )(pre, w_merged)


# --------------------------------------------------------------------------
# Wrapper helpers
# --------------------------------------------------------------------------
def _round_up(n, m):
    return ((n + m - 1) // m) * m


def _pick_time_chunk(T, Bp, H, max_chunk=32):
    """Largest chunk (<= max_chunk) whose double-buffered pre/out footprint stays
    well inside the scoped-VMEM default on every generation (v7x is tightest)."""
    per_t = 4 * Bp * (8 * H + 2 * H) * 2          # f32 bytes per timestep, x2 buffers
    budget = 8 * 1024 * 1024
    return int(max(1, min(max_chunk, budget // per_t, T)))


def _merge_recurrent_weights(w_hh_f, w_hh_b):
    """(4H, H) x2 -> (2H, 8H) block-diagonal, gate-major / direction-minor cols."""
    H = w_hh_f.shape[1]
    wf = jnp.transpose(w_hh_f).reshape(H, 4, H)   # [h_in, gate, h_out]
    wb = jnp.transpose(w_hh_b).reshape(H, 4, H)
    wm = jnp.zeros((2, H, 4, 2, H), jnp.float32)
    wm = wm.at[0, :, :, 0, :].set(wf)             # forward block
    wm = wm.at[1, :, :, 1, :].set(wb)             # backward block
    return wm.reshape(2 * H, 8 * H)


def init_bilstm_params(key, input_size, hidden_size, num_layers=2):
    """Deterministic synthetic params matching nn.LSTM shapes / init range."""
    bound = 1.0 / float(hidden_size) ** 0.5
    params = []
    for layer in range(num_layers):
        in_l = input_size if layer == 0 else 2 * hidden_size
        layer_params = []
        for _direction in range(2):
            key, k1, k2, k3, k4 = jax.random.split(key, 5)
            w_ih = jax.random.uniform(k1, (4 * hidden_size, in_l), jnp.float32, -bound, bound)
            w_hh = jax.random.uniform(k2, (4 * hidden_size, hidden_size), jnp.float32, -bound, bound)
            b_ih = jax.random.uniform(k3, (4 * hidden_size,), jnp.float32, -bound, bound)
            b_hh = jax.random.uniform(k4, (4 * hidden_size,), jnp.float32, -bound, bound)
            layer_params.append((w_ih, w_hh, b_ih, b_hh))
        params.append(layer_params)
    return params


def bilstm_forward(x, params, max_time_chunk=32):
    """x: (B, T, input_size), batch_first -> (B, T, 2*hidden_size), like nn.LSTM."""
    B, T, _ = x.shape
    Bp = _round_up(B, 8)                                    # fill all 8 sublanes
    x_tm = jnp.transpose(x, (1, 0, 2)).astype(jnp.float32)  # time-major (T, B, F)
    if Bp != B:
        # Padded batch rows never mix with real rows (batch is always the
        # matmul LHS row dim); they are sliced off at the very end.
        x_tm = jnp.pad(x_tm, ((0, 0), (0, Bp - B), (0, 0)))

    for fwd, bwd in params:
        w_ih_f, w_hh_f, b_ih_f, b_hh_f = fwd
        w_ih_b, w_hh_b, b_ih_b, b_hh_b = bwd
        H = w_hh_f.shape[1]

        # Hoisted, time-parallel input projection with bias folded in
        # (FLOP-dominant part; one big XLA matmul per direction).
        pre_f = jnp.einsum('tbi,gi->tbg', x_tm, w_ih_f,
                           precision=lax.Precision.HIGHEST) + (b_ih_f + b_hh_f)
        pre_b = jnp.einsum('tbi,gi->tbg', x_tm, w_ih_b,
                           precision=lax.Precision.HIGHEST) + (b_ih_b + b_hh_b)

        # Gate-major / direction-minor layout; backward gates time-reversed so
        # the kernel walks a single monotonic time index for both directions.
        pre_f = pre_f.reshape(T, Bp, 4, H)
        pre_b = pre_b[::-1].reshape(T, Bp, 4, H)
        pre = jnp.concatenate([pre_f, pre_b], axis=-1).reshape(T, Bp, 8 * H)

        Tc = _pick_time_chunk(T, Bp, H, max_time_chunk)
        Tp = _round_up(T, Tc)
        if Tp != T:
            # Padding sits AFTER the last real step of each direction's walk,
            # so real-timestep outputs are unaffected.
            pre = jnp.pad(pre, ((0, Tp - T), (0, 0), (0, 0)))

        w_merged = _merge_recurrent_weights(w_hh_f, w_hh_b)
        out = _bilstm_layer(pre, w_merged, Tc)[:T]           # (T, Bp, 2H)

        h_f = out[:, :, :H]                                  # forward, natural time
        h_b = out[::-1, :, H:]                               # backward, un-reversed
        x_tm = jnp.concatenate([h_f, h_b], axis=-1)          # next layer input

    return jnp.transpose(x_tm, (1, 0, 2))[:B]


# ---------- pure-JAX reference (for correctness check) ----------
def _lstm_ref_direction(x_tm, w_ih, w_hh, b_ih, b_hh):
    T, B, _ = x_tm.shape
    H = w_hh.shape[1]

    def step(carry, x_t):
        h, c = carry
        gates = (jnp.dot(x_t, w_ih.T, precision=lax.Precision.HIGHEST)
                 + jnp.dot(h, w_hh.T, precision=lax.Precision.HIGHEST)
                 + b_ih + b_hh)
        i = jax.nn.sigmoid(gates[:, :H])
        f = jax.nn.sigmoid(gates[:, H:2 * H])
        g = jnp.tanh(gates[:, 2 * H:3 * H])
        o = jax.nn.sigmoid(gates[:, 3 * H:])
        c = f * c + i * g
        h = o * jnp.tanh(c)
        return (h, c), h

    init = (jnp.zeros((B, H), jnp.float32), jnp.zeros((B, H), jnp.float32))
    _, hs = lax.scan(step, init, x_tm)
    return hs


def bilstm_ref(x, params):
    x_tm = jnp.transpose(x, (1, 0, 2)).astype(jnp.float32)
    for layer_params in params:
        dir_outs = []
        for d, (w_ih, w_hh, b_ih, b_hh) in enumerate(layer_params):
            x_in = x_tm[::-1] if d == 1 else x_tm
            out = _lstm_ref_direction(x_in, w_ih, w_hh, b_ih, b_hh)
            if d == 1:
                out = out[::-1]
            dir_outs.append(out)
        x_tm = jnp.concatenate(dir_outs, axis=-1)
    return jnp.transpose(x_tm, (1, 0, 2))


if __name__ == "__main__":
    B, T, INPUT_SIZE, HIDDEN_SIZE = 2, 8, 16, 32

    key = jax.random.PRNGKey(0)
    kx, kp = jax.random.split(key)
    x = jax.random.normal(kx, (B, T, INPUT_SIZE), jnp.float32)
    params = init_bilstm_params(kp, INPUT_SIZE, HIDDEN_SIZE, num_layers=2)

    out = jax.block_until_ready(jax.jit(bilstm_forward)(x, params))
    ref = jax.block_until_ready(bilstm_ref(x, params))

    assert out.shape == (B, T, 2 * HIDDEN_SIZE), out.shape
    err = float(jnp.max(jnp.abs(out - ref)))
    assert jnp.allclose(out, ref, atol=1e-5, rtol=1e-5), err
    print("KERNEL_OK")
</pallas_src>

<mosaic_0001>
module attributes {stable_mosaic.version = 11 : i64} {
  func.func @_bilstm_chunk_kernel(%arg0: i32, %arg1: memref<8x8x256xf32, #tpu.memory_space<vmem>>, %arg2: memref<64x256xf32, #tpu.memory_space<vmem>>, %arg3: memref<8x8x64xf32, #tpu.memory_space<vmem>>, %arg4: memref<8x64xf32, #tpu.memory_space<vmem>>, %arg5: memref<8x64xf32, #tpu.memory_space<vmem>>) attributes {dimension_semantics = [#tpu.dimension_semantics<arbitrary>], iteration_bounds = array<i64: 1>, scalar_prefetch = 0 : i64, scratch_operands = 2 : i64, tpu.core_type = #tpu.core_type<tc>, window_params = [{transform_indices = @transform_0, window_bounds = array<i64: 8, 8, 256>}, {pipeline_mode = #tpu.pipeline_mode<synchronous>, transform_indices = @transform_1, window_bounds = array<i64: 64, 256>}, {transform_indices = @transform_2, window_bounds = array<i64: 8, 8, 64>}]} {
    %c0_i32 = arith.constant 0 : i32
    %0 = arith.cmpi eq, %arg0, %c0_i32 : i32
    %1 = arith.extui %0 : i1 to i32
    %c0_i32_0 = arith.constant 0 : i32
    %2 = arith.cmpi ne, %1, %c0_i32_0 : i32
    scf.if %2 {
      %cst_82 = arith.constant 0.000000e+00 : f32
      %264 = vector.broadcast %cst_82 : f32 to vector<8x64xf32>
      %c0_83 = arith.constant 0 : index
      %c0_84 = arith.constant 0 : index
      %265 = vector.load %arg4[%c0_83, %c0_84] : memref<8x64xf32, #tpu.memory_space<vmem>>, vector<8x64xf32>
      tpu.vector_store %arg4[%c0_83, %c0_84], %264 {strides = array<i32>} : memref<8x64xf32, #tpu.memory_space<vmem>>, vector<8x64xf32>,
      %cst_85 = arith.constant 0.000000e+00 : f32
      %266 = vector.broadcast %cst_85 : f32 to vector<8x64xf32>
      %c0_86 = arith.constant 0 : index
      %c0_87 = arith.constant 0 : index
      %267 = vector.load %arg5[%c0_86, %c0_87] : memref<8x64xf32, #tpu.memory_space<vmem>>, vector<8x64xf32>
      tpu.vector_store %arg5[%c0_86, %c0_87], %266 {strides = array<i32>} : memref<8x64xf32, #tpu.memory_space<vmem>>, vector<8x64xf32>,
    } else {
    }
    %c0 = arith.constant 0 : index
    %c0_1 = arith.constant 0 : index
    %3 = vector.load %arg2[%c0, %c0_1] : memref<64x256xf32, #tpu.memory_space<vmem>>, vector<64x256xf32>
    %c0_2 = arith.constant 0 : index
    %c0_3 = arith.constant 0 : index
    %4 = vector.load %arg4[%c0_2, %c0_3] : memref<8x64xf32, #tpu.memory_space<vmem>>, vector<8x64xf32>
    %c0_4 = arith.constant 0 : index
    %c0_5 = arith.constant 0 : index
    %5 = vector.load %arg5[%c0_4, %c0_5] : memref<8x64xf32, #tpu.memory_space<vmem>>, vector<8x64xf32>
    %c0_6 = arith.constant 0 : index
    %c0_7 = arith.constant 0 : index
    %c0_8 = arith.constant 0 : index
    %6 = vector.load %arg1[%c0_6, %c0_7, %c0_8] : memref<8x8x256xf32, #tpu.memory_space<vmem>>, vector<1x8x256xf32>
    %7 = vector.shape_cast %6 : vector<1x8x256xf32> to vector<8x256xf32>
    %cst = arith.constant dense<0.000000e+00> : vector<8x256xf32>
    %8 = tpu.matmul %4, %3, %cst {dimension_numbers = #tpu.dot_dimension_numbers<[1], [0], [0], [1], [0, 0, 1, 1], [], []>} : vector<8x64xf32>, vector<64x256xf32>, vector<8x256xf32> -> vector<8x256xf32>
    %9 = arith.addf %7, %8 : vector<8x256xf32>
    %10 = vector.extract_strided_slice %9 {offsets = [0, 0], sizes = [8, 64], strides = [1, 1]} : vector<8x256xf32> to vector<8x64xf32>
    %11 = arith.negf %10 : vector<8x64xf32>
    %12 = math.exp %11 : vector<8x64xf32>
    %cst_9 = arith.constant 1.000000e+00 : f32
    %13 = vector.broadcast %cst_9 : f32 to vector<8x64xf32>
    %14 = arith.addf %13, %12 : vector<8x64xf32>
    %15 = arith.divf %13, %14 : vector<8x64xf32>
    %16 = vector.extract_strided_slice %9 {offsets = [0, 64], sizes = [8, 64], strides = [1, 1]} : vector<8x256xf32> to vector<8x64xf32>
    %17 = arith.negf %16 : vector<8x64xf32>
    %18 = math.exp %17 : vector<8x64xf32>
    %cst_10 = arith.constant 1.000000e+00 : f32
    %19 = vector.broadcast %cst_10 : f32 to vector<8x64xf32>
    %20 = arith.addf %19, %18 : vector<8x64xf32>
    %21 = arith.divf %19, %20 : vector<8x64xf32>
    %22 = vector.extract_strided_slice %9 {offsets = [0, 128], sizes = [8, 64], strides = [1, 1]} : vector<8x256xf32> to vector<8x64xf32>
    %23 = math.tanh %22 : vector<8x64xf32>
    %24 = vector.extract_strided_slice %9 {offsets = [0, 192], sizes = [8, 64], strides = [1, 1]} : vector<8x256xf32> to vector<8x64xf32>
    %25 = arith.negf %24 : vector<8x64xf32>
    %26 = math.exp %25 : vector<8x64xf32>
    %cst_11 = arith.constant 1.000000e+00 : f32
    %27 = vector.broadcast %cst_11 : f32 to vector<8x64xf32>
    %28 = arith.addf %27, %26 : vector<8x64xf32>
    %29 = arith.divf %27, %28 : vector<8x64xf32>
    %30 = arith.mulf %21, %5 : vector<8x64xf32>
    %31 = arith.mulf %15, %23 : vector<8x64xf32>
    %32 = arith.addf %30, %31 : vector<8x64xf32>
    %33 = math.tanh %32 : vector<8x64xf32>
    %34 = arith.mulf %29, %33 : vector<8x64xf32>
    %c0_12 = arith.constant 0 : index
    %c0_13 = arith.constant 0 : index
    %c0_14 = arith.constant 0 : index
    %35 = vector.load %arg3[%c0_12, %c0_13, %c0_14] : memref<8x8x64xf32, #tpu.memory_space<vmem>>, vector<1x8x64xf32>
    %36 = vector.shape_cast %35 : vector<1x8x64xf32> to vector<8x64xf32>
    %37 = vector.shape_cast %34 : vector<8x64xf32> to vector<1x8x64xf32>
    tpu.vector_store %arg3[%c0_12, %c0_13, %c0_14], %37 {strides = array<i32>} : memref<8x8x64xf32, #tpu.memory_space<vmem>>, vector<1x8x64xf32>,
    %c1 = arith.constant 1 : index
    %c0_15 = arith.constant 0 : index
    %c0_16 = arith.constant 0 : index
    %38 = vector.load %arg1[%c1, %c0_15, %c0_16] : memref<8x8x256xf32, #tpu.memory_space<vmem>>, vector<1x8x256xf32>
    %39 = vector.shape_cast %38 : vector<1x8x256xf32> to vector<8x256xf32>
    %cst_17 = arith.constant dense<0.000000e+00> : vector<8x256xf32>
    %40 = tpu.matmul %34, %3, %cst_17 {dimension_numbers = #tpu.dot_dimension_numbers<[1], [0], [0], [1], [0, 0, 1, 1], [], []>} : vector<8x64xf32>, vector<64x256xf32>, vector<8x256xf32> -> vector<8x256xf32>
    %41 = arith.addf %39, %40 : vector<8x256xf32>
    %42 = vector.extract_strided_slice %41 {offsets = [0, 0], sizes = [8, 64], strides = [1, 1]} : vector<8x256xf32> to vector<8x64xf32>
    %43 = arith.negf %42 : vector<8x64xf32>
    %44 = math.exp %43 : vector<8x64xf32>
    %cst_18 = arith.constant 1.000000e+00 : f32
    %45 = vector.broadcast %cst_18 : f32 to vector<8x64xf32>
    %46 = arith.addf %45, %44 : vector<8x64xf32>
    %47 = arith.divf %45, %46 : vector<8x64xf32>
    %48 = vector.extract_strided_slice %41 {offsets = [0, 64], sizes = [8, 64], strides = [1, 1]} : vector<8x256xf32> to vector<8x64xf32>
    %49 = arith.negf %48 : vector<8x64xf32>
    %50 = math.exp %49 : vector<8x64xf32>
    %cst_19 = arith.constant 1.000000e+00 : f32
    %51 = vector.broadcast %cst_19 : f32 to vector<8x64xf32>
    %52 = arith.addf %51, %50 : vector<8x64xf32>
    %53 = arith.divf %51, %52 : vector<8x64xf32>
    %54 = vector.extract_strided_slice %41 {offsets = [0, 128], sizes = [8, 64], strides = [1, 1]} : vector<8x256xf32> to vector<8x64xf32>
    %55 = math.tanh %54 : vector<8x64xf32>
    %56 = vector.extract_strided_slice %41 {offsets = [0, 192], sizes = [8, 64], strides = [1, 1]} : vector<8x256xf32> to vector<8x64xf32>
    %57 = arith.negf %56 : vector<8x64xf32>
    %58 = math.exp %57 : vector<8x64xf32>
    %cst_20 = arith.constant 1.000000e+00 : f32
    %59 = vector.broadcast %cst_20 : f32 to vector<8x64xf32>
    %60 = arith.addf %59, %58 : vector<8x64xf32>
    %61 = arith.divf %59, %60 : vector<8x64xf32>
    %62 = arith.mulf %53, %32 : vector<8x64xf32>
    %63 = arith.mulf %47, %55 : vector<8x64xf32>
    %64 = arith.addf %62, %63 : vector<8x64xf32>
    %65 = math.tanh %64 : vector<8x64xf32>
    %66 = arith.mulf %61, %65 : vector<8x64xf32>
    %c1_21 = arith.constant 1 : index
    %c0_22 = arith.constant 0 : index
    %c0_23 = arith.constant 0 : index
    %67 = vector.load %arg3[%c1_21, %c0_22, %c0_23] : memref<8x8x64xf32, #tpu.memory_space<vmem>>, vector<1x8x64xf32>
    %68 = vector.shape_cast %67 : vector<1x8x64xf32> to vector<8x64xf32>
    %69 = vector.shape_cast %66 : vector<8x64xf32> to vector<1x8x64xf32>
    tpu.vector_store %arg3[%c1_21, %c0_22, %c0_23], %69 {strides = array<i32>} : memref<8x8x64xf32, #tpu.memory_space<vmem>>, vector<1x8x64xf32>,
    %c2 = arith.constant 2 : index
    %c0_24 = arith.constant 0 : index
    %c0_25 = arith.constant 0 : index
    %70 = vector.load %arg1[%c2, %c0_24, %c0_25] : memref<8x8x256xf32, #tpu.memory_space<vmem>>, vector<1x8x256xf32>
    %71 = vector.shape_cast %70 : vector<1x8x256xf32> to vector<8x256xf32>
    %cst_26 = arith.constant dense<0.000000e+00> : vector<8x256xf32>
    %72 = tpu.matmul %66, %3, %cst_26 {dimension_numbers = #tpu.dot_dimension_numbers<[1], [0], [0], [1], [0, 0, 1, 1], [], []>} : vector<8x64xf32>, vector<64x256xf32>, vector<8x256xf32> -> vector<8x256xf32>
    %73 = arith.addf %71, %72 : vector<8x256xf32>
    %74 = vector.extract_strided_slice %73 {offsets = [0, 0], sizes = [8, 64], strides = [1, 1]} : vector<8x256xf32> to vector<8x64xf32>
    %75 = arith.negf %74 : vector<8x64xf32>
    %76 = math.exp %75 : vector<8x64xf32>
    %cst_27 = arith.constant 1.000000e+00 : f32
    %77 = vector.broadcast %cst_27 : f32 to vector<8x64xf32>
    %78 = arith.addf %77, %76 : vector<8x64xf32>
    %79 = arith.divf %77, %78 : vector<8x64xf32>
    %80 = vector.extract_strided_slice %73 {offsets = [0, 64], sizes = [8, 64], strides = [1, 1]} : vector<8x256xf32> to vector<8x64xf32>
    %81 = arith.negf %80 : vector<8x64xf32>
    %82 = math.exp %81 : vector<8x64xf32>
    %cst_28 = arith.constant 1.000000e+00 : f32
    %83 = vector.broadcast %cst_28 : f32 to vector<8x64xf32>
    %84 = arith.addf %83, %82 : vector<8x64xf32>
    %85 = arith.divf %83, %84 : vector<8x64xf32>
    %86 = vector.extract_strided_slice %73 {offsets = [0, 128], sizes = [8, 64], strides = [1, 1]} : vector<8x256xf32> to vector<8x64xf32>
    %87 = math.tanh %86 : vector<8x64xf32>
    %88 = vector.extract_strided_slice %73 {offsets = [0, 192], sizes = [8, 64], strides = [1, 1]} : vector<8x256xf32> to vector<8x64xf32>
    %89 = arith.negf %88 : vector<8x64xf32>
    %90 = math.exp %89 : vector<8x64xf32>
    %cst_29 = arith.constant 1.000000e+00 : f32
    %91 = vector.broadcast %cst_29 : f32 to vector<8x64xf32>
    %92 = arith.addf %91, %90 : vector<8x64xf32>
    %93 = arith.divf %91, %92 : vector<8x64xf32>
    %94 = arith.mulf %85, %64 : vector<8x64xf32>
    %95 = arith.mulf %79, %87 : vector<8x64xf32>
    %96 = arith.addf %94, %95 : vector<8x64xf32>
    %97 = math.tanh %96 : vector<8x64xf32>
    %98 = arith.mulf %93, %97 : vector<8x64xf32>
    %c2_30 = arith.constant 2 : index
    %c0_31 = arith.constant 0 : index
    %c0_32 = arith.constant 0 : index
    %99 = vector.load %arg3[%c2_30, %c0_31, %c0_32] : memref<8x8x64xf32, #tpu.memory_space<vmem>>, vector<1x8x64xf32>
    %100 = vector.shape_cast %99 : vector<1x8x64xf32> to vector<8x64xf32>
    %101 = vector.shape_cast %98 : vector<8x64xf32> to vector<1x8x64xf32>
    tpu.vector_store %arg3[%c2_30, %c0_31, %c0_32], %101 {strides = array<i32>} : memref<8x8x64xf32, #tpu.memory_space<vmem>>, vector<1x8x64xf32>,
    %c3 = arith.constant 3 : index
    %c0_33 = arith.constant 0 : index
    %c0_34 = arith.constant 0 : index
    %102 = vector.load %arg1[%c3, %c0_33, %c0_34] : memref<8x8x256xf32, #tpu.memory_space<vmem>>, vector<1x8x256xf32>
    %103 = vector.shape_cast %102 : vector<1x8x256xf32> to vector<8x256xf32>
    %cst_35 = arith.constant dense<0.000000e+00> : vector<8x256xf32>
    %104 = tpu.matmul %98, %3, %cst_35 {dimension_numbers = #tpu.dot_dimension_numbers<[1], [0], [0], [1], [0, 0, 1, 1], [], []>} : vector<8x64xf32>, vector<64x256xf32>, vector<8x256xf32> -> vector<8x256xf32>
    %105 = arith.addf %103, %104 : vector<8x256xf32>
    %106 = vector.extract_strided_slice %105 {offsets = [0, 0], sizes = [8, 64], strides = [1, 1]} : vector<8x256xf32> to vector<8x64xf32>
    %107 = arith.negf %106 : vector<8x64xf32>
    %108 = math.exp %107 : vector<8x64xf32>
    %cst_36 = arith.constant 1.000000e+00 : f32
    %109 = vector.broadcast %cst_36 : f32 to vector<8x64xf32>
    %110 = arith.addf %109, %108 : vector<8x64xf32>
    %111 = arith.divf %109, %110 : vector<8x64xf32>
    %112 = vector.extract_strided_slice %105 {offsets = [0, 64], sizes = [8, 64], strides = [1, 1]} : vector<8x256xf32> to vector<8x64xf32>
    %113 = arith.negf %112 : vector<8x64xf32>
    %114 = math.exp %113 : vector<8x64xf32>
    %cst_37 = arith.constant 1.000000e+00 : f32
    %115 = vector.broadcast %cst_37 : f32 to vector<8x64xf32>
    %116 = arith.addf %115, %114 : vector<8x64xf32>
    %117 = arith.divf %115, %116 : vector<8x64xf32>
    %118 = vector.extract_strided_slice %105 {offsets = [0, 128], sizes = [8, 64], strides = [1, 1]} : vector<8x256xf32> to vector<8x64xf32>
    %119 = math.tanh %118 : vector<8x64xf32>
    %120 = vector.extract_strided_slice %105 {offsets = [0, 192], sizes = [8, 64], strides = [1, 1]} : vector<8x256xf32> to vector<8x64xf32>
    %121 = arith.negf %120 : vector<8x64xf32>
    %122 = math.exp %121 : vector<8x64xf32>
    %cst_38 = arith.constant 1.000000e+00 : f32
    %123 = vector.broadcast %cst_38 : f32 to vector<8x64xf32>
    %124 = arith.addf %123, %122 : vector<8x64xf32>
    %125 = arith.divf %123, %124 : vector<8x64xf32>
    %126 = arith.mulf %117, %96 : vector<8x64xf32>
    %127 = arith.mulf %111, %119 : vector<8x64xf32>
    %128 = arith.addf %126, %127 : vector<8x64xf32>
    %129 = math.tanh %128 : vector<8x64xf32>
    %130 = arith.mulf %125, %129 : vector<8x64xf32>
    %c3_39 = arith.constant 3 : index
    %c0_40 = arith.constant 0 : index
    %c0_41 = arith.constant 0 : index
    %131 = vector.load %arg3[%c3_39, %c0_40, %c0_41] : memref<8x8x64xf32, #tpu.memory_space<vmem>>, vector<1x8x64xf32>
    %132 = vector.shape_cast %131 : vector<1x8x64xf32> to vector<8x64xf32>
    %133 = vector.shape_cast %130 : vector<8x64xf32> to vector<1x8x64xf32>
    tpu.vector_store %arg3[%c3_39, %c0_40, %c0_41], %133 {strides = array<i32>} : memref<8x8x64xf32, #tpu.memory_space<vmem>>, vector<1x8x64xf32>,
    %c4 = arith.constant 4 : index
    %c0_42 = arith.constant 0 : index
    %c0_43 = arith.constant 0 : index
    %134 = vector.load %arg1[%c4, %c0_42, %c0_43] : memref<8x8x256xf32, #tpu.memory_space<vmem>>, vector<1x8x256xf32>
    %135 = vector.shape_cast %134 : vector<1x8x256xf32> to vector<8x256xf32>
    %cst_44 = arith.constant dense<0.000000e+00> : vector<8x256xf32>
    %136 = tpu.matmul %130, %3, %cst_44 {dimension_numbers = #tpu.dot_dimension_numbers<[1], [0], [0], [1], [0, 0, 1, 1], [], []>} : vector<8x64xf32>, vector<64x256xf32>, vector<8x256xf32> -> vector<8x256xf32>
    %137 = arith.addf %135, %136 : vector<8x256xf32>
    %138 = vector.extract_strided_slice %137 {offsets = [0, 0], sizes = [8, 64], strides = [1, 1]} : vector<8x256xf32> to vector<8x64xf32>
    %139 = arith.negf %138 : vector<8x64xf32>
    %140 = math.exp %139 : vector<8x64xf32>
    %cst_45 = arith.constant 1.000000e+00 : f32
    %141 = vector.broadcast %cst_45 : f32 to vector<8x64xf32>
    %142 = arith.addf %141, %140 : vector<8x64xf32>
    %143 = arith.divf %141, %142 : vector<8x64xf32>
    %144 = vector.extract_strided_slice %137 {offsets = [0, 64], sizes = [8, 64], strides = [1, 1]} : vector<8x256xf32> to vector<8x64xf32>
    %145 = arith.negf %144 : vector<8x64xf32>
    %146 = math.exp %145 : vector<8x64xf32>
    %cst_46 = arith.constant 1.000000e+00 : f32
    %147 = vector.broadcast %cst_46 : f32 to vector<8x64xf32>
    %148 = arith.addf %147, %146 : vector<8x64xf32>
    %149 = arith.divf %147, %148 : vector<8x64xf32>
    %150 = vector.extract_strided_slice %137 {offsets = [0, 128], sizes = [8, 64], strides = [1, 1]} : vector<8x256xf32> to vector<8x64xf32>
    %151 = math.tanh %150 : vector<8x64xf32>
    %152 = vector.extract_strided_slice %137 {offsets = [0, 192], sizes = [8, 64], strides = [1, 1]} : vector<8x256xf32> to vector<8x64xf32>
    %153 = arith.negf %152 : vector<8x64xf32>
    %154 = math.exp %153 : vector<8x64xf32>
    %cst_47 = arith.constant 1.000000e+00 : f32
    %155 = vector.broadcast %cst_47 : f32 to vector<8x64xf32>
    %156 = arith.addf %155, %154 : vector<8x64xf32>
    %157 = arith.divf %155, %156 : vector<8x64xf32>
    %158 = arith.mulf %149, %128 : vector<8x64xf32>
    %159 = arith.mulf %143, %151 : vector<8x64xf32>
    %160 = arith.addf %158, %159 : vector<8x64xf32>
    %161 = math.tanh %160 : vector<8x64xf32>
    %162 = arith.mulf %157, %161 : vector<8x64xf32>
    %c4_48 = arith.constant 4 : index
    %c0_49 = arith.constant 0 : index
    %c0_50 = arith.constant 0 : index
    %163 = vector.load %arg3[%c4_48, %c0_49, %c0_50] : memref<8x8x64xf32, #tpu.memory_space<vmem>>, vector<1x8x64xf32>
    %164 = vector.shape_cast %163 : vector<1x8x64xf32> to vector<8x64xf32>
    %165 = vector.shape_cast %162 : vector<8x64xf32> to vector<1x8x64xf32>
    tpu.vector_store %arg3[%c4_48, %c0_49, %c0_50], %165 {strides = array<i32>} : memref<8x8x64xf32, #tpu.memory_space<vmem>>, vector<1x8x64xf32>,
    %c5 = arith.constant 5 : index
    %c0_51 = arith.constant 0 : index
    %c0_52 = arith.constant 0 : index
    %166 = vector.load %arg1[%c5, %c0_51, %c0_52] : memref<8x8x256xf32, #tpu.memory_space<vmem>>, vector<1x8x256xf32>
    %167 = vector.shape_cast %166 : vector<1x8x256xf32> to vector<8x256xf32>
    %cst_53 = arith.constant dense<0.000000e+00> : vector<8x256xf32>
    %168 = tpu.matmul %162, %3, %cst_53 {dimension_numbers = #tpu.dot_dimension_numbers<[1], [0], [0], [1], [0, 0, 1, 1], [], []>} : vector<8x64xf32>, vector<64x256xf32>, vector<8x256xf32> -> vector<8x256xf32>
    %169 = arith.addf %167, %168 : vector<8x256xf32>
    %170 = vector.extract_strided_slice %169 {offsets = [0, 0], sizes = [8, 64], strides = [1, 1]} : vector<8x256xf32> to vector<8x64xf32>
    %171 = arith.negf %170 : vector<8x64xf32>
    %172 = math.exp %171 : vector<8x64xf32>
    %cst_54 = arith.constant 1.000000e+00 : f32
    %173 = vector.broadcast %cst_54 : f32 to vector<8x64xf32>
    %174 = arith.addf %173, %172 : vector<8x64xf32>
    %175 = arith.divf %173, %174 : vector<8x64xf32>
    %176 = vector.extract_strided_slice %169 {offsets = [0, 64], sizes = [8, 64], strides = [1, 1]} : vector<8x256xf32> to vector<8x64xf32>
    %177 = arith.negf %176 : vector<8x64xf32>
    %178 = math.exp %177 : vector<8x64xf32>
    %cst_55 = arith.constant 1.000000e+00 : f32
    %179 = vector.broadcast %cst_55 : f32 to vector<8x64xf32>
    %180 = arith.addf %179, %178 : vector<8x64xf32>
    %181 = arith.divf %179, %180 : vector<8x64xf32>
    %182 = vector.extract_strided_slice %169 {offsets = [0, 128], sizes = [8, 64], strides = [1, 1]} : vector<8x256xf32> to vector<8x64xf32>
    %183 = math.tanh %182 : vector<8x64xf32>
    %184 = vector.extract_strided_slice %169 {offsets = [0, 192], sizes = [8, 64], strides = [1, 1]} : vector<8x256xf32> to vector<8x64xf32>
    %185 = arith.negf %184 : vector<8x64xf32>
    %186 = math.exp %185 : vector<8x64xf32>
    %cst_56 = arith.constant 1.000000e+00 : f32
    %187 = vector.broadcast %cst_56 : f32 to vector<8x64xf32>
    %188 = arith.addf %187, %186 : vector<8x64xf32>
    %189 = arith.divf %187, %188 : vector<8x64xf32>
    %190 = arith.mulf %181, %160 : vector<8x64xf32>
    %191 = arith.mulf %175, %183 : vector<8x64xf32>
    %192 = arith.addf %190, %191 : vector<8x64xf32>
    %193 = math.tanh %192 : vector<8x64xf32>
    %194 = arith.mulf %189, %193 : vector<8x64xf32>
    %c5_57 = arith.constant 5 : index
    %c0_58 = arith.constant 0 : index
    %c0_59 = arith.constant 0 : index
    %195 = vector.load %arg3[%c5_57, %c0_58, %c0_59] : memref<8x8x64xf32, #tpu.memory_space<vmem>>, vector<1x8x64xf32>
    %196 = vector.shape_cast %195 : vector<1x8x64xf32> to vector<8x64xf32>
    %197 = vector.shape_cast %194 : vector<8x64xf32> to vector<1x8x64xf32>
    tpu.vector_store %arg3[%c5_57, %c0_58, %c0_59], %197 {strides = array<i32>} : memref<8x8x64xf32, #tpu.memory_space<vmem>>, vector<1x8x64xf32>,
    %c6 = arith.constant 6 : index
    %c0_60 = arith.constant 0 : index
    %c0_61 = arith.constant 0 : index
    %198 = vector.load %arg1[%c6, %c0_60, %c0_61] : memref<8x8x256xf32, #tpu.memory_space<vmem>>, vector<1x8x256xf32>
    %199 = vector.shape_cast %198 : vector<1x8x256xf32> to vector<8x256xf32>
    %cst_62 = arith.constant dense<0.000000e+00> : vector<8x256xf32>
    %200 = tpu.matmul %194, %3, %cst_62 {dimension_numbers = #tpu.dot_dimension_numbers<[1], [0], [0], [1], [0, 0, 1, 1], [], []>} : vector<8x64xf32>, vector<64x256xf32>, vector<8x256xf32> -> vector<8x256xf32>
    %201 = arith.addf %199, %200 : vector<8x256xf32>
    %202 = vector.extract_strided_slice %201 {offsets = [0, 0], sizes = [8, 64], strides = [1, 1]} : vector<8x256xf32> to vector<8x64xf32>
    %203 = arith.negf %202 : vector<8x64xf32>
    %204 = math.exp %203 : vector<8x64xf32>
    %cst_63 = arith.constant 1.000000e+00 : f32
    %205 = vector.broadcast %cst_63 : f32 to vector<8x64xf32>
    %206 = arith.addf %205, %204 : vector<8x64xf32>
    %207 = arith.divf %205, %206 : vector<8x64xf32>
    %208 = vector.extract_strided_slice %201 {offsets = [0, 64], sizes = [8, 64], strides = [1, 1]} : vector<8x256xf32> to vector<8x64xf32>
    %209 = arith.negf %208 : vector<8x64xf32>
    %210 = math.exp %209 : vector<8x64xf32>
    %cst_64 = arith.constant 1.000000e+00 : f32
    %211 = vector.broadcast %cst_64 : f32 to vector<8x64xf32>
    %212 = arith.addf %211, %210 : vector<8x64xf32>
    %213 = arith.divf %211, %212 : vector<8x64xf32>
    %214 = vector.extract_strided_slice %201 {offsets = [0, 128], sizes = [8, 64], strides = [1, 1]} : vector<8x256xf32> to vector<8x64xf32>
    %215 = math.tanh %214 : vector<8x64xf32>
    %216 = vector.extract_strided_slice %201 {offsets = [0, 192], sizes = [8, 64], strides = [1, 1]} : vector<8x256xf32> to vector<8x64xf32>
    %217 = arith.negf %216 : vector<8x64xf32>
    %218 = math.exp %217 : vector<8x64xf32>
    %cst_65 = arith.constant 1.000000e+00 : f32
    %219 = vector.broadcast %cst_65 : f32 to vector<8x64xf32>
    %220 = arith.addf %219, %218 : vector<8x64xf32>
    %221 = arith.divf %219, %220 : vector<8x64xf32>
    %222 = arith.mulf %213, %192 : vector<8x64xf32>
    %223 = arith.mulf %207, %215 : vector<8x64xf32>
    %224 = arith.addf %222, %223 : vector<8x64xf32>
    %225 = math.tanh %224 : vector<8x64xf32>
    %226 = arith.mulf %221, %225 : vector<8x64xf32>
    %c6_66 = arith.constant 6 : index
    %c0_67 = arith.constant 0 : index
    %c0_68 = arith.constant 0 : index
    %227 = vector.load %arg3[%c6_66, %c0_67, %c0_68] : memref<8x8x64xf32, #tpu.memory_space<vmem>>, vector<1x8x64xf32>
    %228 = vector.shape_cast %227 : vector<1x8x64xf32> to vector<8x64xf32>
    %229 = vector.shape_cast %226 : vector<8x64xf32> to vector<1x8x64xf32>
    tpu.vector_store %arg3[%c6_66, %c0_67, %c0_68], %229 {strides = array<i32>} : memref<8x8x64xf32, #tpu.memory_space<vmem>>, vector<1x8x64xf32>,
    %c7 = arith.constant 7 : index
    %c0_69 = arith.constant 0 : index
    %c0_70 = arith.constant 0 : index
    %230 = vector.load %arg1[%c7, %c0_69, %c0_70] : memref<8x8x256xf32, #tpu.memory_space<vmem>>, vector<1x8x256xf32>
    %231 = vector.shape_cast %230 : vector<1x8x256xf32> to vector<8x256xf32>
    %cst_71 = arith.constant dense<0.000000e+00> : vector<8x256xf32>
    %232 = tpu.matmul %226, %3, %cst_71 {dimension_numbers = #tpu.dot_dimension_numbers<[1], [0], [0], [1], [0, 0, 1, 1], [], []>} : vector<8x64xf32>, vector<64x256xf32>, vector<8x256xf32> -> vector<8x256xf32>
    %233 = arith.addf %231, %232 : vector<8x256xf32>
    %234 = vector.extract_strided_slice %233 {offsets = [0, 0], sizes = [8, 64], strides = [1, 1]} : vector<8x256xf32> to vector<8x64xf32>
    %235 = arith.negf %234 : vector<8x64xf32>
    %236 = math.exp %235 : vector<8x64xf32>
    %cst_72 = arith.constant 1.000000e+00 : f32
    %237 = vector.broadcast %cst_72 : f32 to vector<8x64xf32>
    %238 = arith.addf %237, %236 : vector<8x64xf32>
    %239 = arith.divf %237, %238 : vector<8x64xf32>
    %240 = vector.extract_strided_slice %233 {offsets = [0, 64], sizes = [8, 64], strides = [1, 1]} : vector<8x256xf32> to vector<8x64xf32>
    %241 = arith.negf %240 : vector<8x64xf32>
    %242 = math.exp %241 : vector<8x64xf32>
    %cst_73 = arith.constant 1.000000e+00 : f32
    %243 = vector.broadcast %cst_73 : f32 to vector<8x64xf32>
    %244 = arith.addf %243, %242 : vector<8x64xf32>
    %245 = arith.divf %243, %244 : vector<8x64xf32>
    %246 = vector.extract_strided_slice %233 {offsets = [0, 128], sizes = [8, 64], strides = [1, 1]} : vector<8x256xf32> to vector<8x64xf32>
    %247 = math.tanh %246 : vector<8x64xf32>
    %248 = vector.extract_strided_slice %233 {offsets = [0, 192], sizes = [8, 64], strides = [1, 1]} : vector<8x256xf32> to vector<8x64xf32>
    %249 = arith.negf %248 : vector<8x64xf32>
    %250 = math.exp %249 : vector<8x64xf32>
    %cst_74 = arith.constant 1.000000e+00 : f32
    %251 = vector.broadcast %cst_74 : f32 to vector<8x64xf32>
    %252 = arith.addf %251, %250 : vector<8x64xf32>
    %253 = arith.divf %251, %252 : vector<8x64xf32>
    %254 = arith.mulf %245, %224 : vector<8x64xf32>
    %255 = arith.mulf %239, %247 : vector<8x64xf32>
    %256 = arith.addf %254, %255 : vector<8x64xf32>
    %257 = math.tanh %256 : vector<8x64xf32>
    %258 = arith.mulf %253, %257 : vector<8x64xf32>
    %c7_75 = arith.constant 7 : index
    %c0_76 = arith.constant 0 : index
    %c0_77 = arith.constant 0 : index
    %259 = vector.load %arg3[%c7_75, %c0_76, %c0_77] : memref<8x8x64xf32, #tpu.memory_space<vmem>>, vector<1x8x64xf32>
    %260 = vector.shape_cast %259 : vector<1x8x64xf32> to vector<8x64xf32>
    %261 = vector.shape_cast %258 : vector<8x64xf32> to vector<1x8x64xf32>
    tpu.vector_store %arg3[%c7_75, %c0_76, %c0_77], %261 {strides = array<i32>} : memref<8x8x64xf32, #tpu.memory_space<vmem>>, vector<1x8x64xf32>,
    %c0_78 = arith.constant 0 : index
    %c0_79 = arith.constant 0 : index
    %262 = vector.load %arg4[%c0_78, %c0_79] : memref<8x64xf32, #tpu.memory_space<vmem>>, vector<8x64xf32>
    tpu.vector_store %arg4[%c0_78, %c0_79], %258 {strides = array<i32>} : memref<8x64xf32, #tpu.memory_space<vmem>>, vector<8x64xf32>,
    %c0_80 = arith.constant 0 : index
    %c0_81 = arith.constant 0 : index
    %263 = vector.load %arg5[%c0_80, %c0_81] : memref<8x64xf32, #tpu.memory_space<vmem>>, vector<8x64xf32>
    tpu.vector_store %arg5[%c0_80, %c0_81], %256 {strides = array<i32>} : memref<8x64xf32, #tpu.memory_space<vmem>>, vector<8x64xf32>,
    return
  }
  func.func @transform_0(%arg0: i32) -> (i32, i32, i32) {
    %c0_i32 = arith.constant 0 : i32
    %c0_i32_0 = arith.constant 0 : i32
    %c0_i32_1 = arith.constant 0 : i32
    return %arg0, %c0_i32, %c0_i32_0 : i32, i32, i32
  }
  func.func @transform_1(%arg0: i32) -> (i32, i32) {
    %c0_i32 = arith.constant 0 : i32
    %c0_i32_0 = arith.constant 0 : i32
    %c0_i32_1 = arith.constant 0 : i32
    return %c0_i32, %c0_i32_0 : i32, i32
  }
  func.func @transform_2(%arg0: i32) -> (i32, i32, i32) {
    %c0_i32 = arith.constant 0 : i32
    %c0_i32_0 = arith.constant 0 : i32
    %c0_i32_1 = arith.constant 0 : i32
    return %arg0, %c0_i32, %c0_i32_0 : i32, i32, i32
  }
}

</mosaic_0001>

<bundles_post_ra>
// kernel: bilstm_forward.2
= control target key start
LH: loop header
LB: loop body
LE: loop exit
PB: predicated region body
PF: predicated region fallthrough
CT: control target
= control target key end

     0   :  { %vm15_vm0 = vcmask 523264   ;;  %v1041_v3 = vmov 0.0   ;;  %s1042_s3 = smov 64   ;;  %s1386_s1 = inlined_call_operand.vmem [shape: f32[64,256], index: 1, kind: input, shape index: {}]   ;;  %s1387_s0 = inlined_call_operand.vmem [shape: f32[8,8,256], index: 0, kind: input, shape index: {}]   ;;  %s1388_s2 = inlined_call_operand.vmem [shape: f32[8,8,64], index: 2, kind: output, shape index: {}]  }
   0x1   :  { %v1061_v0 = vld [vmem:[%s1386_s1 + $0x78] sm:$0xff]  ;;  %v1066_v1 = vld [vmem:[%s1386_s1 + $0x70] sm:$0xff]  ;;  %v1071_v2 = vld [vmem:[%s1386_s1 + $0x68] sm:$0xff]  ;;  %106 = vmatprep.mubr.f32.mxu0 %v1041_v3  ;;  %16 = vst.msk [vmem:[#allocation2] sm:$0xff] %vm15_vm0, %v1041_v3  ;;  %215 = vmatprep.mubr.f32.mxu1 %v1041_v3 }
   0x2   :  { %17 = vst.msk [vmem:[#allocation3] sm:$0xff] %vm15_vm0, %v1041_v3  ;;  %58 = vmatprep.subr.mxu0 %v1061_v0  ;;  %v1083_v4 = vld [vmem:[%s1386_s1 + $0x60] sm:$0xff]  ;;  %167 = vmatprep.subr.mxu1 %v1061_v0  ;;  %v1090_v5 = vld [vmem:[%s1386_s1 + $0x58] sm:$0xff]  ;;  %v1097_v6 = vld [vmem:[%s1386_s1 + $0x50] sm:$0xff] }
   0x3   :  { %59 = vmatpush1.msra.mxu0 %v1066_v1  ;;  %168 = vmatpush1.msra.mxu1 %v1066_v1  ;;  %v1104_v7 = vld [vmem:[%s1386_s1 + $0x48] sm:$0xff]  ;;  %v1111_v8 = vld [vmem:[%s1386_s1 + $0x40] sm:$0xff]  ;;  %v1118_v9 = vld [vmem:[%s1386_s1 + $0x38] sm:$0xff] }
   0x4   :  { %60 = vmatprep.subr.mxu0 %v1071_v2  ;;  %169 = vmatprep.subr.mxu1 %v1071_v2  ;;  %v1125_v10 = vld [vmem:[%s1386_s1 + $0x30] sm:$0xff]  ;;  %v1132_v12 = vld [vmem:[%s1386_s1 + $0x28] sm:$0xff]  ;;  %v1139_v13 = vld [vmem:[%s1386_s1 + $0x20] sm:$0xff] }
   0x5   :  { %61 = vmatpush1.msra.mxu0 %v1083_v4  ;;  %170 = vmatpush1.msra.mxu1 %v1083_v4  ;;  %v1146_v14 = vld [vmem:[%s1386_s1 + $0x18] sm:$0xff]  ;;  %v1153_v15 = vld [vmem:[%s1386_s1 + $0x10] sm:$0xff]  ;;  %v1160_v16 = vld [vmem:[%s1386_s1 + $0x8] sm:$0xff] }
   0x6   :  { %62 = vmatprep.subr.mxu0 %v1090_v5  ;;  %171 = vmatprep.subr.mxu1 %v1090_v5  ;;  %v1167_v17 = vld [vmem:[%s1386_s1] sm:$0xff]  ;;  %v37_v23 = vld [vmem:[%s1387_s0 + $0x8] sm:$0xff]  ;;  %v901_v42 = vld [vmem:[%s1387_s0 + $0x10] sm:$0xff] }
   0x7   :  { %63 = vmatpush1.msra.mxu0 %v1097_v6  ;;  %172 = vmatpush1.msra.mxu1 %v1097_v6  ;;  %v36_v19 = vld [vmem:[%s1387_s0] sm:$0xff]  ;;  %v902_v46 = vld [vmem:[%s1387_s0 + $0x18] sm:$0xff] }
   0x8   :  { %64 = vmatprep.subr.mxu0 %v1104_v7  ;;  %173 = vmatprep.subr.mxu1 %v1104_v7  ;;  %v34_v18 = vld [vmem:[#allocation2] sm:$0xff] }
   0x9   :  { %v35_v11 = vld [vmem:[#allocation3] sm:$0xff]  ;;  %65 = vmatpush1.msra.mxu0 %v1111_v8  ;;  %174 = vmatpush1.msra.mxu1 %v1111_v8 }
   0xa   :  { %129 = vrot.lane.b32.xlu0 %v35_v11, %s1042_s3  ;;  %66 = vmatprep.subr.mxu0 %v1118_v9  ;;  %v907_v11 = vld [vmem:[%s1387_s0 + $0x20] sm:$0xff] }
   0xb   :  { %67 = vmatpush1.msra.mxu0 %v1125_v10  ;;  %175 = vmatprep.subr.mxu1 %v1118_v9 }
   0xc   :  { %68 = vmatprep.subr.mxu0 %v1132_v12  ;;  %176 = vmatpush1.msra.mxu1 %v1125_v10 }
   0xd   :  { %69 = vmatpush1.msra.mxu0 %v1139_v13  ;;  %177 = vmatprep.subr.mxu1 %v1132_v12 }
   0xe   :  { %70 = vmatprep.subr.mxu0 %v1146_v14  ;;  %178 = vmatpush1.msra.mxu1 %v1139_v13 }
   0xf   :  { %71 = vmatpush1.msra.mxu0 %v1153_v15  ;;  %179 = vmatprep.subr.mxu1 %v1146_v14 }
  0x10   :  { %72 = vmatprep.subr.mxu0 %v1160_v16  ;;  %180 = vmatpush1.msra.mxu1 %v1153_v15 }
  0x11   :  { %73 = vmatpush1.msra.mxu0 %v1167_v17  ;;  %181 = vmatprep.subr.mxu1 %v1160_v16 }
  0x12   :  { %898 = vmatmul.mubr.msk.f32.vlgmr.msra.gmra.mxu0 %vm15_vm0, %v34_v18  ;;  %182 = vmatpush1.msra.mxu1 %v1167_v17 }
  0x13   :  { %273 = vmatprep.subr.mxu0 %v1061_v0  ;;  %321 = vmatprep.mubr.f32.mxu0 %v1041_v3 }
  0x14   :  { %274 = vmatpush1.msra.mxu0 %v1066_v1  ;;  %379 = vmatprep.subr.mxu1 %v1061_v0 }
  0x15   :  { %275 = vmatprep.subr.mxu0 %v1071_v2 }
  0x16   :  { %276 = vmatpush1.msra.mxu0 %v1083_v4 }
  0x17   :  { %277 = vmatprep.subr.mxu0 %v1090_v5 }
  0x18   :  { %278 = vmatpush1.msra.mxu0 %v1097_v6 }
  0x19   :  { %279 = vmatprep.subr.mxu0 %v1104_v7 }
  0x1a   :  { %280 = vmatpush1.msra.mxu0 %v1111_v8 }
  0x1b   :  { %281 = vmatprep.subr.mxu0 %v1118_v9 }
  0x1c   :  { %282 = vmatpush1.msra.mxu0 %v1125_v10 }
  0x1d   :  { %283 = vmatprep.subr.mxu0 %v1132_v12 }
  0x1e   :  { %284 = vmatpush1.msra.mxu0 %v1139_v13 }
  0x1f   :  { %285 = vmatprep.subr.mxu0 %v1146_v14 }
  0x20   :  { %286 = vmatpush1.msra.mxu0 %v1153_v15 }
  0x21   :  { %287 = vmatprep.subr.mxu0 %v1160_v16 }
  0x22   :  { %288 = vmatpush1.msra.mxu0 %v1167_v17 }
  0x23   :  { %485 = vmatprep.subr.mxu0 %v1061_v0 }
  0x7c   :  { %v130_v33 = vpop.permute.xlu0 %129 }
  0xd2   :  { %v108_v20 = vpop.f32.mrf.mxu0 }
  0xd3   :  { %v113_v21 = vadd.f32 %v108_v20, %v36_v19 }
  0xd4   :  { %v110_v24 = vpop.f32.mrf.mxu0 }
  0xd5   :  { %v899_v22 = vmul.f32 -1.442695, %v113_v21  ;;  %v114_v25 = vadd.f32 %v110_v24, %v37_v23  ;;  %v908_v21 = vld [vmem:[%s1387_s0 + $0x28] sm:$0xff] }
  0xd7   :  { %945 = vpow2.f32 %v899_v22  ;;  %v900_v31 = vmul.f32 -1.442695, %v114_v25 }
  0xd8   :  { %947 = vtanh.f32 %v114_v25 }
  0xe4   :  { %v946_v26 = vpop.eup %945 }
  0xe5   :  { %v118_v27 = vadd.f32 1.0, %v946_v26  ;;  %v948_v28 = vpop.eup %947 }
  0xe7   :  { %949 = vrcp.f32 %v118_v27 }
  0xe8   :  { %951 = vpow2.f32 %v900_v31 }
  0xf4   :  { %v950_v29 = vpop.eup %949 }
  0xf5   :  { %v133_v30 = vmul.f32 %v950_v29, %v948_v28  ;;  %v952_v32 = vpop.eup %951  ;;  %v132_v35 = vmul.f32 %v950_v29, %v130_v33 }
  0xf6   :  { %v125_v34 = vadd.f32 1.0, %v952_v32 }
  0xf7   :  { %135 = vrot.lane.b32.xlu0 %v133_v30, %s1042_s3 }
  0xf8   :  { %953 = vrcp.f32 %v125_v34 }
 0x105   :  { %v954_v38 = vpop.eup %953 }
 0x169   :  { %v136_v36 = vpop.permute.xlu0 %135 }
 0x16a   :  { %v138_v37 = vadd.f32 %v136_v36, %v132_v35 }
 0x16c   :  { %955 = vtanh.f32 %v138_v37 }
 0x179   :  { %v956_v39 = vpop.eup %955 }
 0x17a   :  { %v140_v40 = vmul.f32 %v956_v39, %v954_v38  ;;  %v913_v39 = vld [vmem:[%s1387_s0 + $0x30] sm:$0xff] }
 0x17c   :  { %142 = vrot.lane.b32.xlu1 %v140_v40, %s1042_s3 }
 0x1ee   :  { %v143_v41 = vpop.permute.xlu1 %142 }
 0x1ef   :  { %145 = vst.msk [vmem:[%s1388_s2] sm:$0xff] %vm15_vm0, %v143_v41  ;;  %903 = vmatmul.mubr.msk.f32.vlgmr.msra.gmra.mxu1 %vm15_vm0, %v143_v41 }
 0x1f0   :  { %380 = vmatpush1.msra.mxu1 %v1066_v1  ;;  %427 = vmatprep.mubr.f32.mxu1 %v1041_v3 }
 0x1f1   :  { %381 = vmatprep.subr.mxu1 %v1071_v2 }
 0x1f2   :  { %382 = vmatpush1.msra.mxu1 %v1083_v4 }
 0x1f3   :  { %383 = vmatprep.subr.mxu1 %v1090_v5 }
 0x1f4   :  { %384 = vmatpush1.msra.mxu1 %v1097_v6 }
 0x1f5   :  { %385 = vmatprep.subr.mxu1 %v1104_v7 }
 0x1f6   :  { %386 = vmatpush1.msra.mxu1 %v1111_v8 }
 0x1f7   :  { %387 = vmatprep.subr.mxu1 %v1118_v9 }
 0x1f8   :  { %388 = vmatpush1.msra.mxu1 %v1125_v10 }
 0x1f9   :  { %389 = vmatprep.subr.mxu1 %v1132_v12 }
 0x1fa   :  { %390 = vmatpush1.msra.mxu1 %v1139_v13 }
 0x1fb   :  { %391 = vmatprep.subr.mxu1 %v1146_v14 }
 0x1fc   :  { %392 = vmatpush1.msra.mxu1 %v1153_v15 }
 0x1fd   :  { %393 = vmatprep.subr.mxu1 %v1160_v16 }
 0x1fe   :  { %394 = vmatpush1.msra.mxu1 %v1167_v17 }
 0x1ff   :  { %591 = vmatprep.subr.mxu1 %v1061_v0 }
 0x2af   :  { %v217_v43 = vpop.f32.mrf.mxu1 }
 0x2b0   :  { %v222_v44 = vadd.f32 %v901_v42, %v217_v43  ;;  %v914_v43 = vld [vmem:[%s1387_s0 + $0x38] sm:$0xff] }
 0x2b1   :  { %v219_v47 = vpop.f32.mrf.mxu1 }
 0x2b2   :  { %v904_v45 = vmul.f32 -1.442695, %v222_v44  ;;  %v223_v48 = vadd.f32 %v902_v46, %v219_v47 }
 0x2b4   :  { %957 = vpow2.f32 %v904_v45  ;;  %v905_v54 = vmul.f32 -1.442695, %v223_v48 }
 0x2b5   :  { %959 = vtanh.f32 %v223_v48 }
 0x2c1   :  { %v958_v49 = vpop.eup %957 }
 0x2c2   :  { %v227_v50 = vadd.f32 1.0, %v958_v49  ;;  %v960_v51 = vpop.eup %959 }
 0x2c4   :  { %961 = vrcp.f32 %v227_v50 }
 0x2c5   :  { %963 = vpow2.f32 %v905_v54 }
 0x2d1   :  { %v962_v52 = vpop.eup %961 }
 0x2d2   :  { %v238_v53 = vmul.f32 %v962_v52, %v960_v51  ;;  %v964_v55 = vpop.eup %963  ;;  %v237_v57 = vmul.f32 %v962_v52, %v138_v37 }
 0x2d3   :  { %v234_v56 = vadd.f32 1.0, %v964_v55 }
 0x2d4   :  { %240 = vrot.lane.b32.xlu1 %v238_v53, %s1042_s3 }
 0x2d5   :  { %965 = vrcp.f32 %v234_v56 }
 0x2e2   :  { %v966_v60 = vpop.eup %965 }
 0x346   :  { %v241_v58 = vpop.permute.xlu1 %240 }
 0x347   :  { %v243_v59 = vadd.f32 %v241_v58, %v237_v57 }
 0x349   :  { %967 = vtanh.f32 %v243_v59 }
 0x356   :  { %v968_v61 = vpop.eup %967 }
 0x357   :  { %v245_v62 = vmul.f32 %v968_v61, %v966_v60  ;;  %v919_v60 = vld [vmem:[%s1387_s0 + $0x40] sm:$0xff] }
 0x359   :  { %247 = vrot.lane.b32.xlu0 %v245_v62, %s1042_s3 }
 0x3cb   :  { %v248_v63 = vpop.permute.xlu0 %247 }
 0x3cc   :  { %906 = vst.msk [vmem:[%s1388_s2 + $0x8] sm:$0xff] %vm15_vm0, %v248_v63  ;;  %909 = vmatmul.mubr.msk.f32.vlgmr.msra.gmra.mxu0 %vm15_vm0, %v248_v63 }
 0x3cd   :  { %486 = vmatpush1.msra.mxu0 %v1066_v1  ;;  %533 = vmatprep.mubr.f32.mxu0 %v1041_v3 }
 0x3ce   :  { %487 = vmatprep.subr.mxu0 %v1071_v2 }
 0x3cf   :  { %488 = vmatpush1.msra.mxu0 %v1083_v4 }
 0x3d0   :  { %489 = vmatprep.subr.mxu0 %v1090_v5 }
 0x3d1   :  { %490 = vmatpush1.msra.mxu0 %v1097_v6 }
 0x3d2   :  { %491 = vmatprep.subr.mxu0 %v1104_v7 }
 0x3d3   :  { %492 = vmatpush1.msra.mxu0 %v1111_v8 }
 0x3d4   :  { %493 = vmatprep.subr.mxu0 %v1118_v9 }
 0x3d5   :  { %494 = vmatpush1.msra.mxu0 %v1125_v10 }
 0x3d6   :  { %495 = vmatprep.subr.mxu0 %v1132_v12 }
 0x3d7   :  { %496 = vmatpush1.msra.mxu0 %v1139_v13 }
 0x3d8   :  { %497 = vmatprep.subr.mxu0 %v1146_v14 }
 0x3d9   :  { %498 = vmatpush1.msra.mxu0 %v1153_v15 }
 0x3da   :  { %499 = vmatprep.subr.mxu0 %v1160_v16 }
 0x3db   :  { %500 = vmatpush1.msra.mxu0 %v1167_v17 }
 0x3dc   :  { %697 = vmatprep.subr.mxu0 %v1061_v0 }
 0x48c   :  { %v323_v18 = vpop.f32.mrf.mxu0 }
 0x48d   :  { %v328_v19 = vadd.f32 %v907_v11, %v323_v18  ;;  %v920_v11 = vld [vmem:[%s1387_s0 + $0x48] sm:$0xff] }
 0x48e   :  { %v325_v22 = vpop.f32.mrf.mxu0 }
 0x48f   :  { %v910_v20 = vmul.f32 -1.442695, %v328_v19  ;;  %v329_v23 = vadd.f32 %v908_v21, %v325_v22 }
 0x491   :  { %969 = vpow2.f32 %v910_v20  ;;  %v911_v29 = vmul.f32 -1.442695, %v329_v23 }
 0x492   :  { %971 = vtanh.f32 %v329_v23 }
 0x49e   :  { %v970_v24 = vpop.eup %969 }
 0x49f   :  { %v333_v25 = vadd.f32 1.0, %v970_v24  ;;  %v972_v26 = vpop.eup %971 }
 0x4a1   :  { %973 = vrcp.f32 %v333_v25 }
 0x4a2   :  { %975 = vpow2.f32 %v911_v29 }
 0x4ae   :  { %v974_v27 = vpop.eup %973 }
 0x4af   :  { %v344_v28 = vmul.f32 %v974_v27, %v972_v26  ;;  %v976_v30 = vpop.eup %975  ;;  %v343_v32 = vmul.f32 %v974_v27, %v243_v59 }
 0x4b0   :  { %v340_v31 = vadd.f32 1.0, %v976_v30 }
 0x4b1   :  { %346 = vrot.lane.b32.xlu1 %v344_v28, %s1042_s3 }
 0x4b2   :  { %977 = vrcp.f32 %v340_v31 }
 0x4bf   :  { %v978_v35 = vpop.eup %977 }
 0x523   :  { %v347_v33 = vpop.permute.xlu1 %346 }
 0x524   :  { %v349_v34 = vadd.f32 %v347_v33, %v343_v32 }
 0x526   :  { %979 = vtanh.f32 %v349_v34 }
 0x533   :  { %v980_v36 = vpop.eup %979 }
 0x534   :  { %v351_v37 = vmul.f32 %v980_v36, %v978_v35 }
 0x536   :  { %353 = vrot.lane.b32.xlu0 %v351_v37, %s1042_s3 }
 0x5a8   :  { %v354_v38 = vpop.permute.xlu0 %353 }
 0x5a9   :  { %912 = vst.msk [vmem:[%s1388_s2 + $0x10] sm:$0xff] %vm15_vm0, %v354_v38  ;;  %915 = vmatmul.mubr.msk.f32.vlgmr.msra.gmra.mxu1 %vm15_vm0, %v354_v38 }
 0x5aa   :  { %592 = vmatpush1.msra.mxu1 %v1066_v1  ;;  %639 = vmatprep.mubr.f32.mxu1 %v1041_v3 }
 0x5ab   :  { %593 = vmatprep.subr.mxu1 %v1071_v2 }
 0x5ac   :  { %594 = vmatpush1.msra.mxu1 %v1083_v4 }
 0x5ad   :  { %595 = vmatprep.subr.mxu1 %v1090_v5 }
 0x5ae   :  { %596 = vmatpush1.msra.mxu1 %v1097_v6 }
 0x5af   :  { %597 = vmatprep.subr.mxu1 %v1104_v7 }
 0x5b0   :  { %598 = vmatpush1.msra.mxu1 %v1111_v8 }
 0x5b1   :  { %599 = vmatprep.subr.mxu1 %v1118_v9 }
 0x5b2   :  { %600 = vmatpush1.msra.mxu1 %v1125_v10 }
 0x5b3   :  { %601 = vmatprep.subr.mxu1 %v1132_v12 }
 0x5b4   :  { %602 = vmatpush1.msra.mxu1 %v1139_v13 }
 0x5b5   :  { %603 = vmatprep.subr.mxu1 %v1146_v14 }
 0x5b6   :  { %604 = vmatpush1.msra.mxu1 %v1153_v15 }
 0x5b7   :  { %605 = vmatprep.subr.mxu1 %v1160_v16 }
 0x5b8   :  { %606 = vmatpush1.msra.mxu1 %v1167_v17 }
 0x5b9   :  { %803 = vmatprep.subr.mxu1 %v1061_v0 }
 0x669   :  { %v429_v40 = vpop.f32.mrf.mxu1 }
 0x66a   :  { %v434_v41 = vadd.f32 %v913_v39, %v429_v40 }
 0x66b   :  { %v431_v44 = vpop.f32.mrf.mxu1 }
 0x66c   :  { %v916_v42 = vmul.f32 -1.442695, %v434_v41  ;;  %v435_v45 = vadd.f32 %v914_v43, %v431_v44  ;;  %v931_v41 = vld [vmem:[%s1387_s0 + $0x60] sm:$0xff] }
 0x66e   :  { %981 = vpow2.f32 %v916_v42  ;;  %v917_v50 = vmul.f32 -1.442695, %v435_v45 }
 0x66f   :  { %983 = vtanh.f32 %v435_v45  ;;  %v932_v45 = vld [vmem:[%s1387_s0 + $0x68] sm:$0xff] }
 0x67b   :  { %v982_v46 = vpop.eup %981 }
 0x67c   :  { %v439_v47 = vadd.f32 1.0, %v982_v46  ;;  %v984_v48 = vpop.eup %983 }
 0x67e   :  { %985 = vrcp.f32 %v439_v47 }
 0x67f   :  { %987 = vpow2.f32 %v917_v50 }
 0x68b   :  { %v986_v0 = vpop.eup %985 }
 0x68c   :  { %v450_v49 = vmul.f32 %v986_v0, %v984_v48  ;;  %v988_v51 = vpop.eup %987  ;;  %v449_v53 = vmul.f32 %v986_v0, %v349_v34 }
 0x68d   :  { %v446_v52 = vadd.f32 1.0, %v988_v51 }
 0x68e   :  { %452 = vrot.lane.b32.xlu1 %v450_v49, %s1042_s3 }
 0x68f   :  { %989 = vrcp.f32 %v446_v52 }
 0x69c   :  { %v990_v56 = vpop.eup %989 }
 0x700   :  { %v453_v54 = vpop.permute.xlu1 %452 }
 0x701   :  { %v455_v55 = vadd.f32 %v453_v54, %v449_v53 }
 0x703   :  { %991 = vtanh.f32 %v455_v55 }
 0x710   :  { %v992_v57 = vpop.eup %991 }
 0x711   :  { %v457_v58 = vmul.f32 %v992_v57, %v990_v56 }
 0x713   :  { %459 = vrot.lane.b32.xlu0 %v457_v58, %s1042_s3 }
 0x785   :  { %v460_v59 = vpop.permute.xlu0 %459 }
 0x786   :  { %918 = vst.msk [vmem:[%s1388_s2 + $0x18] sm:$0xff] %vm15_vm0, %v460_v59  ;;  %921 = vmatmul.mubr.msk.f32.vlgmr.msra.gmra.mxu0 %vm15_vm0, %v460_v59 }
 0x787   :  { %698 = vmatpush1.msra.mxu0 %v1066_v1  ;;  %745 = vmatprep.mubr.f32.mxu0 %v1041_v3 }
 0x788   :  { %699 = vmatprep.subr.mxu0 %v1071_v2 }
 0x789   :  { %700 = vmatpush1.msra.mxu0 %v1083_v4 }
 0x78a   :  { %701 = vmatprep.subr.mxu0 %v1090_v5 }
 0x78b   :  { %702 = vmatpush1.msra.mxu0 %v1097_v6 }
 0x78c   :  { %703 = vmatprep.subr.mxu0 %v1104_v7 }
 0x78d   :  { %704 = vmatpush1.msra.mxu0 %v1111_v8 }
 0x78e   :  { %705 = vmatprep.subr.mxu0 %v1118_v9 }
 0x78f   :  { %706 = vmatpush1.msra.mxu0 %v1125_v10 }
 0x790   :  { %707 = vmatprep.subr.mxu0 %v1132_v12 }
 0x791   :  { %708 = vmatpush1.msra.mxu0 %v1139_v13 }
 0x792   :  { %709 = vmatprep.subr.mxu0 %v1146_v14 }
 0x793   :  { %710 = vmatpush1.msra.mxu0 %v1153_v15 }
 0x794   :  { %711 = vmatprep.subr.mxu0 %v1160_v16 }
 0x795   :  { %712 = vmatpush1.msra.mxu0 %v1167_v17 }
 0x846   :  { %v535_v61 = vpop.f32.mrf.mxu0 }
 0x847   :  { %v540_v62 = vadd.f32 %v919_v60, %v535_v61 }
 0x848   :  { %v537_v18 = vpop.f32.mrf.mxu0 }
 0x849   :  { %v922_v63 = vmul.f32 -1.442695, %v540_v62  ;;  %v541_v19 = vadd.f32 %v920_v11, %v537_v18  ;;  %v937_v62 = vld [vmem:[%s1387_s0 + $0x70] sm:$0xff] }
 0x84b   :  { %993 = vpow2.f32 %v922_v63  ;;  %v923_v25 = vmul.f32 -1.442695, %v541_v19 }
 0x84c   :  { %995 = vtanh.f32 %v541_v19  ;;  %v938_v19 = vld [vmem:[%s1387_s0 + $0x78] sm:$0xff] }
 0x858   :  { %v994_v20 = vpop.eup %993 }
 0x859   :  { %v545_v21 = vadd.f32 1.0, %v994_v20  ;;  %v996_v22 = vpop.eup %995 }
 0x85b   :  { %997 = vrcp.f32 %v545_v21 }
 0x85c   :  { %999 = vpow2.f32 %v923_v25 }
 0x868   :  { %v998_v23 = vpop.eup %997 }
 0x869   :  { %v556_v24 = vmul.f32 %v998_v23, %v996_v22  ;;  %v1000_v26 = vpop.eup %999  ;;  %v555_v28 = vmul.f32 %v998_v23, %v455_v55 }
 0x86a   :  { %v552_v27 = vadd.f32 1.0, %v1000_v26 }
 0x86b   :  { %558 = vrot.lane.b32.xlu1 %v556_v24, %s1042_s3 }
 0x86c   :  { %1001 = vrcp.f32 %v552_v27 }
 0x879   :  { %v1002_v31 = vpop.eup %1001 }
 0x8dd   :  { %v559_v29 = vpop.permute.xlu1 %558 }
 0x8de   :  { %v561_v30 = vadd.f32 %v559_v29, %v555_v28 }
 0x8e0   :  { %1003 = vtanh.f32 %v561_v30 }
 0x8ed   :  { %v1004_v32 = vpop.eup %1003 }
 0x8ee   :  { %v563_v33 = vmul.f32 %v1004_v32, %v1002_v31 }
 0x8f0   :  { %565 = vrot.lane.b32.xlu0 %v563_v33, %s1042_s3 }
 0x962   :  { %v566_v34 = vpop.permute.xlu0 %565 }
 0x963   :  { %924 = vst.msk [vmem:[%s1388_s2 + $0x20] sm:$0xff] %vm15_vm0, %v566_v34  ;;  %927 = vmatmul.mubr.msk.f32.vlgmr.msra.gmra.mxu1 %vm15_vm0, %v566_v34 }
 0x964   :  { %804 = vmatpush1.msra.mxu1 %v1066_v1  ;;  %851 = vmatprep.mubr.f32.mxu1 %v1041_v3  ;;  %v925_v1 = vld [vmem:[%s1387_s0 + $0x50] sm:$0xff] }
 0x965   :  { %805 = vmatprep.subr.mxu1 %v1071_v2 }
 0x966   :  { %806 = vmatpush1.msra.mxu1 %v1083_v4 }
 0x967   :  { %807 = vmatprep.subr.mxu1 %v1090_v5  ;;  %v926_v5 = vld [vmem:[%s1387_s0 + $0x58] sm:$0xff] }
 0x968   :  { %808 = vmatpush1.msra.mxu1 %v1097_v6 }
 0x969   :  { %809 = vmatprep.subr.mxu1 %v1104_v7 }
 0x96a   :  { %810 = vmatpush1.msra.mxu1 %v1111_v8 }
 0x96b   :  { %811 = vmatprep.subr.mxu1 %v1118_v9 }
 0x96c   :  { %812 = vmatpush1.msra.mxu1 %v1125_v10 }
 0x96d   :  { %813 = vmatprep.subr.mxu1 %v1132_v12 }
 0x96e   :  { %814 = vmatpush1.msra.mxu1 %v1139_v13 }
 0x96f   :  { %815 = vmatprep.subr.mxu1 %v1146_v14 }
 0x970   :  { %816 = vmatpush1.msra.mxu1 %v1153_v15 }
 0x971   :  { %817 = vmatprep.subr.mxu1 %v1160_v16 }
 0x972   :  { %818 = vmatpush1.msra.mxu1 %v1167_v17 }
 0xa23   :  { %v641_v2 = vpop.f32.mrf.mxu1 }
 0xa24   :  { %v646_v3 = vadd.f32 %v925_v1, %v641_v2 }
 0xa25   :  { %v643_v6 = vpop.f32.mrf.mxu1 }
 0xa26   :  { %v928_v4 = vmul.f32 -1.442695, %v646_v3  ;;  %v647_v7 = vadd.f32 %v926_v5, %v643_v6 }
 0xa28   :  { %1005 = vpow2.f32 %v928_v4  ;;  %v929_v14 = vmul.f32 -1.442695, %v647_v7 }
 0xa29   :  { %1007 = vtanh.f32 %v647_v7 }
 0xa35   :  { %v1006_v8 = vpop.eup %1005 }
 0xa36   :  { %v651_v9 = vadd.f32 1.0, %v1006_v8  ;;  %v1008_v10 = vpop.eup %1007 }
 0xa38   :  { %1009 = vrcp.f32 %v651_v9 }
 0xa39   :  { %1011 = vpow2.f32 %v929_v14 }
 0xa45   :  { %v1010_v12 = vpop.eup %1009 }
 0xa46   :  { %v662_v13 = vmul.f32 %v1010_v12, %v1008_v10  ;;  %v1012_v15 = vpop.eup %1011  ;;  %v661_v17 = vmul.f32 %v1010_v12, %v561_v30 }
 0xa47   :  { %v658_v16 = vadd.f32 1.0, %v1012_v15 }
 0xa48   :  { %664 = vrot.lane.b32.xlu1 %v662_v13, %s1042_s3 }
 0xa49   :  { %1013 = vrcp.f32 %v658_v16 }
 0xa56   :  { %v1014_v37 = vpop.eup %1013 }
 0xaba   :  { %v665_v35 = vpop.permute.xlu1 %664 }
 0xabb   :  { %v667_v36 = vadd.f32 %v665_v35, %v661_v17 }
 0xabd   :  { %1015 = vtanh.f32 %v667_v36 }
 0xaca   :  { %v1016_v38 = vpop.eup %1015 }
 0xacb   :  { %v669_v39 = vmul.f32 %v1016_v38, %v1014_v37 }
 0xacd   :  { %671 = vrot.lane.b32.xlu0 %v669_v39, %s1042_s3 }
 0xb3f   :  { %v672_v40 = vpop.permute.xlu0 %671 }
 0xb40   :  { %930 = vst.msk [vmem:[%s1388_s2 + $0x28] sm:$0xff] %vm15_vm0, %v672_v40  ;;  %933 = vmatmul.mubr.msk.f32.vlgmr.msra.gmra.mxu0 %vm15_vm0, %v672_v40 }
 0xc00   :  { %v747_v42 = vpop.f32.mrf.mxu0 }
 0xc01   :  { %v752_v43 = vadd.f32 %v931_v41, %v747_v42 }
 0xc02   :  { %v749_v46 = vpop.f32.mrf.mxu0 }
 0xc03   :  { %v934_v44 = vmul.f32 -1.442695, %v752_v43  ;;  %v753_v47 = vadd.f32 %v932_v45, %v749_v46 }
 0xc05   :  { %1017 = vpow2.f32 %v934_v44  ;;  %v935_v52 = vmul.f32 -1.442695, %v753_v47 }
 0xc06   :  { %1019 = vtanh.f32 %v753_v47 }
 0xc12   :  { %v1018_v48 = vpop.eup %1017 }
 0xc13   :  { %v757_v0 = vadd.f32 1.0, %v1018_v48  ;;  %v1020_v49 = vpop.eup %1019 }
 0xc15   :  { %1021 = vrcp.f32 %v757_v0 }
 0xc16   :  { %1023 = vpow2.f32 %v935_v52 }
 0xc22   :  { %v1022_v50 = vpop.eup %1021 }
 0xc23   :  { %v768_v51 = vmul.f32 %v1022_v50, %v1020_v49  ;;  %v1024_v53 = vpop.eup %1023  ;;  %v767_v55 = vmul.f32 %v1022_v50, %v667_v36 }
 0xc24   :  { %v764_v54 = vadd.f32 1.0, %v1024_v53 }
 0xc25   :  { %770 = vrot.lane.b32.xlu1 %v768_v51, %s1042_s3 }
 0xc26   :  { %1025 = vrcp.f32 %v764_v54 }
 0xc33   :  { %v1026_v58 = vpop.eup %1025 }
 0xc97   :  { %v771_v56 = vpop.permute.xlu1 %770 }
 0xc98   :  { %v773_v57 = vadd.f32 %v771_v56, %v767_v55 }
 0xc9a   :  { %1027 = vtanh.f32 %v773_v57 }
 0xca7   :  { %v1028_v59 = vpop.eup %1027 }
 0xca8   :  { %v775_v60 = vmul.f32 %v1028_v59, %v1026_v58 }
 0xcaa   :  { %777 = vrot.lane.b32.xlu0 %v775_v60, %s1042_s3 }
 0xd1c   :  { %v778_v61 = vpop.permute.xlu0 %777 }
 0xd1d   :  { %936 = vst.msk [vmem:[%s1388_s2 + $0x30] sm:$0xff] %vm15_vm0, %v778_v61  ;;  %939 = vmatmul.mubr.msk.f32.vlgmr.msra.gmra.mxu1 %vm15_vm0, %v778_v61 }
 0xddd   :  { %v853_v63 = vpop.f32.mrf.mxu1 }
 0xdde   :  { %v858_v11 = vadd.f32 %v937_v62, %v853_v63 }
 0xddf   :  { %v855_v20 = vpop.f32.mrf.mxu1 }
 0xde0   :  { %v940_v18 = vmul.f32 -1.442695, %v858_v11  ;;  %v859_v21 = vadd.f32 %v938_v19, %v855_v20 }
 0xde2   :  { %1029 = vpow2.f32 %v940_v18  ;;  %v941_v27 = vmul.f32 -1.442695, %v859_v21 }
 0xde3   :  { %1031 = vtanh.f32 %v859_v21 }
 0xdef   :  { %v1030_v22 = vpop.eup %1029 }
 0xdf0   :  { %v863_v23 = vadd.f32 1.0, %v1030_v22  ;;  %v1032_v24 = vpop.eup %1031 }
 0xdf2   :  { %1033 = vrcp.f32 %v863_v23 }
 0xdf3   :  { %1035 = vpow2.f32 %v941_v27 }
 0xdff   :  { %v1034_v25 = vpop.eup %1033 }
 0xe00   :  { %v874_v26 = vmul.f32 %v1034_v25, %v1032_v24  ;;  %v1036_v28 = vpop.eup %1035  ;;  %v873_v30 = vmul.f32 %v1034_v25, %v773_v57 }
 0xe01   :  { %v870_v29 = vadd.f32 1.0, %v1036_v28 }
 0xe02   :  { %876 = vrot.lane.b32.xlu1 %v874_v26, %s1042_s3 }
 0xe03   :  { %1037 = vrcp.f32 %v870_v29 }
 0xe10   :  { %v1038_v33 = vpop.eup %1037 }
 0xe74   :  { %v877_v31 = vpop.permute.xlu1 %876 }
 0xe75   :  { %v879_v32 = vadd.f32 %v877_v31, %v873_v30 }
 0xe77   :  { %1039 = vtanh.f32 %v879_v32  ;;  %890 = vrot.lane.b32.xlu1 %v879_v32, %s1042_s3 }
 0xe84   :  { %v1040_v34 = vpop.eup %1039 }
 0xe85   :  { %v881_v1 = vmul.f32 %v1040_v34, %v1038_v33 }
 0xe87   :  { %883 = vrot.lane.b32.xlu0 %v881_v1, %s1042_s3 }
 0xee9   :  { %v891_v2 = vpop.permute.xlu1 %890 }
 0xeea   :  { %893 = vst.msk [vmem:[#allocation3] sm:$0xff] %vm15_vm0, %v891_v2 }
 0xef9   :  { %v884_v3 = vpop.permute.xlu0 %883 }
 0xefa   :  { %942 = vst.msk [vmem:[%s1388_s2 + $0x38] sm:$0xff] %vm15_vm0, %v884_v3  ;;  %888 = vst.msk [vmem:[#allocation2] sm:$0xff] %vm15_vm0, %v884_v3 }

</bundles_post_ra>
